<compile_context>
chip_gen: v6e
topology: v6e:2x2x1
jax: 0.10.0
libtpu: 0.0.40
codegen_flags: <defaults>
</compile_context>

<pallas_src>
import functools

import jax
import jax.numpy as jnp
from jax.experimental import pallas as pl
from jax.experimental.pallas import tpu as pltpu

# Explicit scoped-VMEM budget: above v5e/v6e defaults, below v7x's 64 MiB.
_VMEM_LIMIT = 32 * 1024 * 1024


def _round_up(x, m):
    return (x + m - 1) // m * m


# -----------------------------------------------------------------------------
# Grid-parallel (M, K) @ (K, N) + bias kernel (input projection & FC/logits).
# -----------------------------------------------------------------------------
def _matmul_bias_kernel(x_ref, w_ref, b_ref, o_ref):
    o_ref[...] = (jnp.dot(x_ref[...], w_ref[...],
                          preferred_element_type=jnp.float32)
                  + b_ref[...]).astype(o_ref.dtype)


def _matmul_bias(x, w, b, *, tm_cap=256, tn_cap=1024):
    """x: (M, K) f32, w: (K, N) f32, b: (N,) f32 -> (M, N) f32.

    Grid is (N_blocks, M_blocks) with the N axis OUTER, so each (K, tn) weight
    slab is DMA'd from HBM exactly once while the small x row-blocks are
    re-streamed.  Both grid axes are independent output tiles -> 'parallel'.
    """
    M, K = x.shape
    N = w.shape[1]
    tm = tm_cap if M >= tm_cap else _round_up(M, 8)
    tn = tn_cap if N >= tn_cap else _round_up(N, 128)
    M_pad = _round_up(M, tm)
    N_pad = _round_up(N, tn)

    x_p = jnp.pad(x, ((0, M_pad - M), (0, 0))) if M_pad != M else x
    w_p = jnp.pad(w, ((0, 0), (0, N_pad - N))) if N_pad != N else w
    b2 = b.reshape(1, N)
    b_p = jnp.pad(b2, ((0, 0), (0, N_pad - N))) if N_pad != N else b2

    out = pl.pallas_call(
        _matmul_bias_kernel,
        out_shape=jax.ShapeDtypeStruct((M_pad, N_pad), jnp.float32),
        grid_spec=pltpu.PrefetchScalarGridSpec(
            num_scalar_prefetch=0,
            grid=(N_pad // tn, M_pad // tm),             # j (N) outer, i inner
            in_specs=[
                pl.BlockSpec((tm, K), lambda j, i: (i, 0)),
                pl.BlockSpec((K, tn), lambda j, i: (0, j)),
                pl.BlockSpec((1, tn), lambda j, i: (0, j)),
            ],
            out_specs=pl.BlockSpec((tm, tn), lambda j, i: (i, j)),
        ),
        compiler_params=pltpu.CompilerParams(
            dimension_semantics=("parallel", "parallel"),
            vmem_limit_bytes=_VMEM_LIMIT),
    )(x_p, w_p, b_p)
    return out[:M, :N]


# -----------------------------------------------------------------------------
# LSTM recurrence: grid = (batch_blocks [parallel], time [arbitrary]).
# gx slabs stream per timestep, h/c live in VMEM scratch across time steps,
# the hidden sequence is written back per step.
# -----------------------------------------------------------------------------
def _lstm_recurrence(gx, whh_t, *, tb):
    """gx: (T1, B_pad, 4*H_pad) pre-projected inputs (x @ W_ih^T + b_ih + b_hh),
    whh_t: (H_pad, 4*H_pad) pre-transposed recurrent weight.
    Returns the hidden sequence (T1, B_pad, H_pad)."""
    T1, Bp, H4 = gx.shape
    Hp = whh_t.shape[0]

    def kernel(gx_ref, whh_ref, hseq_ref, h_ref, c_ref):
        t = pl.program_id(1)

        @pl.when(t == 0)
        def _():
            h_ref[...] = jnp.zeros_like(h_ref)
            c_ref[...] = jnp.zeros_like(c_ref)

        gates = gx_ref[0] + jnp.dot(h_ref[...], whh_ref[...],
                                    preferred_element_type=jnp.float32)
        # PyTorch gate order i, f, g, o; Hp is a multiple of 128 so every
        # slice is lane-tile aligned (no cross-lane shuffles, unmasked stores).
        i_g = jax.nn.sigmoid(gates[:, 0 * Hp:1 * Hp])
        f_g = jax.nn.sigmoid(gates[:, 1 * Hp:2 * Hp])
        g_g = jnp.tanh(gates[:, 2 * Hp:3 * Hp])
        o_g = jax.nn.sigmoid(gates[:, 3 * Hp:4 * Hp])
        c_new = f_g * c_ref[...] + i_g * g_g
        h_new = o_g * jnp.tanh(c_new)
        c_ref[...] = c_new
        h_ref[...] = h_new
        hseq_ref[0] = h_new

    # TODO(synk): hold W_hh in the MXU weight registers across timesteps via
    # pltpu.matmul_push_rhs / matmul_acc_lhs / matmul_pop to remove the
    # per-step RHS push from the serial critical path.
    return pl.pallas_call(
        kernel,
        out_shape=jax.ShapeDtypeStruct((T1, Bp, Hp), jnp.float32),
        grid_spec=pltpu.PrefetchScalarGridSpec(
            num_scalar_prefetch=0,
            grid=(Bp // tb, T1),
            in_specs=[
                pl.BlockSpec((1, tb, H4), lambda i, t: (t, i, 0)),
                pl.BlockSpec((Hp, H4), lambda i, t: (0, 0)),
            ],
            out_specs=pl.BlockSpec((1, tb, Hp), lambda i, t: (t, i, 0)),
            scratch_shapes=[pltpu.VMEM((tb, Hp), jnp.float32),
                            pltpu.VMEM((tb, Hp), jnp.float32)],
        ),
        compiler_params=pltpu.CompilerParams(
            dimension_semantics=("parallel", "arbitrary"),
            vmem_limit_bytes=_VMEM_LIMIT),
    )(gx, whh_t)


# -----------------------------------------------------------------------------
# One-time weight preparation (hoisted OUT of the per-call forward).
# Zero gate-padding keeps padded hidden units at h = c = 0 for all time
# (i=f=o=0.5, g=0 -> c_new = 0, h_new = 0), so semantics are unchanged.
# -----------------------------------------------------------------------------
def _gate_pad_transpose(w, H, H_pad):
    """w: (4H, K) torch layout -> (K, 4*H_pad) transposed, per-gate padded."""
    K = w.shape[1]
    g = w.reshape(4, H, K)                      # (4, H, K)
    g = jnp.transpose(g, (0, 2, 1))             # (4, K, H)
    g = jnp.pad(g, ((0, 0), (0, 0), (0, H_pad - H)))
    return jnp.transpose(g, (1, 0, 2)).reshape(K, 4 * H_pad).astype(jnp.float32)


def _gate_pad_bias(b, H, H_pad):
    b4 = jnp.pad(b.reshape(4, H), ((0, 0), (0, H_pad - H)))
    return b4.reshape(4 * H_pad).astype(jnp.float32)


def prepare_params(params):
    """Call once; reuse the result for every forward call."""
    H = params["w_hh"].shape[1]
    H_pad = _round_up(H, 128)
    whh_t = _gate_pad_transpose(params["w_hh"], H, H_pad)           # (H, 4H_pad)
    whh_t = jnp.pad(whh_t, ((0, H_pad - H), (0, 0)))                # (H_pad, 4H_pad)
    return {
        "embed": params["embed"].astype(jnp.float32),               # (V, E)
        "wih_t": _gate_pad_transpose(params["w_ih"], H, H_pad),     # (E, 4H_pad)
        "whh_t": whh_t,
        "b_all": _gate_pad_bias(params["b_ih"] + params["b_hh"], H, H_pad),
        "wfc_t": jnp.pad(jnp.transpose(params["w_fc"]).astype(jnp.float32),
                         ((0, H_pad - H), (0, 0))),                 # (H_pad, V)
        "bfc": params["b_fc"].astype(jnp.float32),                  # (V,)
    }


@jax.jit
def caption_generator_forward(features, captions, prepped):
    """features: (B, E) f32, captions: (B, T) int32 -> logits (B, T+1, V)."""
    embed_tbl = prepped["embed"]
    wih_t, whh_t = prepped["wih_t"], prepped["whh_t"]
    b_all = prepped["b_all"]
    wfc_t, bfc = prepped["wfc_t"], prepped["bfc"]

    B, E = features.shape
    T = captions.shape[1]
    T1 = T + 1
    H_pad = whh_t.shape[0]
    V = wfc_t.shape[1]

    B_pad = _round_up(B, 8)        # sublane alignment
    tb = 8                          # recurrence batch tile (bounds vreg pressure)
    for cand in (32, 16, 8):
        if B_pad % cand == 0:
            tb = cand
            break

    # --- glue: embedding gather directly in time-major, prepend features ---
    emb_tm = jnp.take(embed_tbl, jnp.transpose(captions), axis=0)   # (T, B, E)
    inputs_tm = jnp.concatenate(
        [features[None].astype(jnp.float32), emb_tm.astype(jnp.float32)],
        axis=0)                                                     # (T1, B, E)
    if B_pad != B:
        inputs_tm = jnp.pad(inputs_tm, ((0, 0), (0, B_pad - B), (0, 0)))

    # 1) Input projection for ALL timesteps: one grid-parallel matmul.
    # TODO(synk): cast x/w here (and optionally for the FC) to bf16 with f32
    # accumulation for ~2x MXU throughput on v6e/v7x; kept f32 to stay within
    # the 1e-4 tolerance against the f32 reference.
    gx = _matmul_bias(inputs_tm.reshape(T1 * B_pad, E), wih_t, b_all)
    gx = gx.reshape(T1, B_pad, 4 * H_pad)

    # 2) Sequential LSTM recurrence, streamed over time, batch-parallel grid.
    h_seq = _lstm_recurrence(gx, whh_t, tb=tb)                      # (T1, B_pad, H_pad)

    # 3) Logits: transpose only the small H-sized activations to batch-first,
    #    then one matmul where the (H_pad, V) weight is streamed exactly once.
    h_bf = jnp.transpose(h_seq, (1, 0, 2)).reshape(B_pad * T1, H_pad)
    logits = _matmul_bias(h_bf, wfc_t, bfc).reshape(B_pad, T1, V)
    return logits[:B]


def _reference_forward(features, captions, params):
    """Pure-JAX reference (lax.scan LSTM) for a correctness check."""
    embed_tbl = params["embed"]
    w_ih, w_hh = params["w_ih"], params["w_hh"]
    b = params["b_ih"] + params["b_hh"]
    w_fc, b_fc = params["w_fc"], params["b_fc"]
    H = w_hh.shape[1]

    emb = jnp.take(embed_tbl, captions, axis=0)
    inputs = jnp.concatenate([features[:, None, :], emb], axis=1)   # (B, T1, E)
    B = inputs.shape[0]

    def step(carry, x_t):
        h, c = carry
        gates = x_t @ w_ih.T + h @ w_hh.T + b
        i = jax.nn.sigmoid(gates[:, 0 * H:1 * H])
        f = jax.nn.sigmoid(gates[:, 1 * H:2 * H])
        g = jnp.tanh(gates[:, 2 * H:3 * H])
        o = jax.nn.sigmoid(gates[:, 3 * H:4 * H])
        c_new = f * c + i * g
        h_new = o * jnp.tanh(c_new)
        return (h_new, c_new), h_new

    h0 = jnp.zeros((B, H), jnp.float32)
    _, hs = jax.lax.scan(step, (h0, h0), jnp.transpose(inputs, (1, 0, 2)))
    hs = jnp.transpose(hs, (1, 0, 2))                               # (B, T1, H)
    return hs @ w_fc.T + b_fc


if __name__ == "__main__":
    # Small, TPU-friendly shapes consistent with the module's forward.
    B, T = 2, 8
    EMBED, HIDDEN, VOCAB = 32, 64, 128

    key = jax.random.PRNGKey(0)
    keys = jax.random.split(key, 9)

    params = {
        "embed": 0.1 * jax.random.normal(keys[0], (VOCAB, EMBED), jnp.float32),
        "w_ih": 0.1 * jax.random.normal(keys[1], (4 * HIDDEN, EMBED), jnp.float32),
        "w_hh": 0.1 * jax.random.normal(keys[2], (4 * HIDDEN, HIDDEN), jnp.float32),
        "b_ih": 0.1 * jax.random.normal(keys[3], (4 * HIDDEN,), jnp.float32),
        "b_hh": 0.1 * jax.random.normal(keys[4], (4 * HIDDEN,), jnp.float32),
        "w_fc": 0.1 * jax.random.normal(keys[5], (VOCAB, HIDDEN), jnp.float32),
        "b_fc": 0.1 * jax.random.normal(keys[6], (VOCAB,), jnp.float32),
    }

    features = jax.random.normal(keys[7], (B, EMBED), jnp.float32)
    captions = jax.random.randint(keys[8], (B, T), 0, VOCAB, jnp.int32)

    prepped = prepare_params(params)            # one-time weight prep (hoisted)
    out = caption_generator_forward(features, captions, prepped)
    out = jax.block_until_ready(out)
    assert out.shape == (B, T + 1, VOCAB), out.shape

    ref = _reference_forward(features, captions, params)
    assert jnp.allclose(out, ref, atol=1e-4, rtol=1e-4), "mismatch vs reference"

    print("KERNEL_OK")
</pallas_src>

<mosaic_0001>
module attributes {stable_mosaic.version = 11 : i64} {
  func.func @_matmul_bias_kernel(%arg0: i32, %arg1: i32, %arg2: memref<72x32xf32, #tpu.memory_space<vmem>>, %arg3: memref<32x512xf32, #tpu.memory_space<vmem>>, %arg4: memref<1x512xf32, #tpu.memory_space<vmem>>, %arg5: memref<72x512xf32, #tpu.memory_space<vmem>>) attributes {dimension_semantics = [#tpu.dimension_semantics<parallel>, #tpu.dimension_semantics<parallel>], iteration_bounds = array<i64: 1, 1>, scalar_prefetch = 0 : i64, scratch_operands = 0 : i64, tpu.core_type = #tpu.core_type<tc>, window_params = [{transform_indices = @transform_0, window_bounds = array<i64: 72, 32>}, {transform_indices = @transform_1, window_bounds = array<i64: 32, 512>}, {transform_indices = @transform_2, window_bounds = array<i64: 1, 512>}, {transform_indices = @transform_3, window_bounds = array<i64: 72, 512>}]} {
    %c0 = arith.constant 0 : index
    %c0_0 = arith.constant 0 : index
    %0 = vector.load %arg2[%c0, %c0_0] : memref<72x32xf32, #tpu.memory_space<vmem>>, vector<72x32xf32>
    %c0_1 = arith.constant 0 : index
    %c0_2 = arith.constant 0 : index
    %1 = vector.load %arg3[%c0_1, %c0_2] : memref<32x512xf32, #tpu.memory_space<vmem>>, vector<32x512xf32>
    %cst = arith.constant dense<0.000000e+00> : vector<72x512xf32>
    %2 = tpu.matmul %0, %1, %cst {dimension_numbers = #tpu.dot_dimension_numbers<[1], [0], [0], [1], [0, 0, 1, 1], [], []>} : vector<72x32xf32>, vector<32x512xf32>, vector<72x512xf32> -> vector<72x512xf32>
    %c0_3 = arith.constant 0 : index
    %c0_4 = arith.constant 0 : index
    %3 = vector.load %arg4[%c0_3, %c0_4] : memref<1x512xf32, #tpu.memory_space<vmem>>, vector<1x512xf32>
    %4 = vector.broadcast %3 : vector<1x512xf32> to vector<72x512xf32>
    %5 = arith.addf %2, %4 : vector<72x512xf32>
    %c0_5 = arith.constant 0 : index
    %c0_6 = arith.constant 0 : index
    %6 = vector.load %arg5[%c0_5, %c0_6] : memref<72x512xf32, #tpu.memory_space<vmem>>, vector<72x512xf32>
    tpu.vector_store %arg5[%c0_5, %c0_6], %5 {strides = array<i32>} : memref<72x512xf32, #tpu.memory_space<vmem>>, vector<72x512xf32>,
    return
  }
  func.func @transform_0(%arg0: i32, %arg1: i32) -> (i32, i32) {
    %c0_i32 = arith.constant 0 : i32
    %c0_i32_0 = arith.constant 0 : i32
    return %arg1, %c0_i32 : i32, i32
  }
  func.func @transform_1(%arg0: i32, %arg1: i32) -> (i32, i32) {
    %c0_i32 = arith.constant 0 : i32
    %c0_i32_0 = arith.constant 0 : i32
    return %c0_i32, %arg0 : i32, i32
  }
  func.func @transform_2(%arg0: i32, %arg1: i32) -> (i32, i32) {
    %c0_i32 = arith.constant 0 : i32
    %c0_i32_0 = arith.constant 0 : i32
    return %c0_i32, %arg0 : i32, i32
  }
  func.func @transform_3(%arg0: i32, %arg1: i32) -> (i32, i32) {
    %c0_i32 = arith.constant 0 : i32
    return %arg1, %arg0 : i32, i32
  }
}

module attributes {stable_mosaic.version = 11 : i64} {
  func.func @kernel(%arg0: i32, %arg1: i32, %arg2: memref<1x8x512xf32, #tpu.memory_space<vmem>>, %arg3: memref<128x512xf32, #tpu.memory_space<vmem>>, %arg4: memref<1x8x128xf32, #tpu.memory_space<vmem>>, %arg5: memref<8x128xf32, #tpu.memory_space<vmem>>, %arg6: memref<8x128xf32, #tpu.memory_space<vmem>>) attributes {dimension_semantics = [#tpu.dimension_semantics<parallel>, #tpu.dimension_semantics<arbitrary>], iteration_bounds = array<i64: 1, 9>, scalar_prefetch = 0 : i64, scratch_operands = 2 : i64, tpu.core_type = #tpu.core_type<tc>, window_params = [{transform_indices = @transform_0, window_bounds = array<i64: 1, 8, 512>}, {pipeline_mode = #tpu.pipeline_mode<synchronous>, transform_indices = @transform_1, window_bounds = array<i64: 128, 512>}, {transform_indices = @transform_2, window_bounds = array<i64: 1, 8, 128>}]} {
    %c0_i32 = arith.constant 0 : i32
    %0 = arith.cmpi eq, %arg1, %c0_i32 : i32
    %1 = arith.extui %0 : i1 to i32
    %c0_i32_0 = arith.constant 0 : i32
    %2 = arith.cmpi ne, %1, %c0_i32_0 : i32
    scf.if %2 {
      %cst_19 = arith.constant 0.000000e+00 : f32
      %40 = vector.broadcast %cst_19 : f32 to vector<8x128xf32>
      %c0_20 = arith.constant 0 : index
      %c0_21 = arith.constant 0 : index
      %41 = vector.load %arg5[%c0_20, %c0_21] : memref<8x128xf32, #tpu.memory_space<vmem>>, vector<8x128xf32>
      tpu.vector_store %arg5[%c0_20, %c0_21], %40 {strides = array<i32>} : memref<8x128xf32, #tpu.memory_space<vmem>>, vector<8x128xf32>,
      %cst_22 = arith.constant 0.000000e+00 : f32
      %42 = vector.broadcast %cst_22 : f32 to vector<8x128xf32>
      %c0_23 = arith.constant 0 : index
      %c0_24 = arith.constant 0 : index
      %43 = vector.load %arg6[%c0_23, %c0_24] : memref<8x128xf32, #tpu.memory_space<vmem>>, vector<8x128xf32>
      tpu.vector_store %arg6[%c0_23, %c0_24], %42 {strides = array<i32>} : memref<8x128xf32, #tpu.memory_space<vmem>>, vector<8x128xf32>,
    } else {
    }
    %c0 = arith.constant 0 : index
    %c0_1 = arith.constant 0 : index
    %c0_2 = arith.constant 0 : index
    %3 = vector.load %arg2[%c0, %c0_1, %c0_2] : memref<1x8x512xf32, #tpu.memory_space<vmem>>, vector<1x8x512xf32>
    %4 = vector.shape_cast %3 : vector<1x8x512xf32> to vector<8x512xf32>
    %c0_3 = arith.constant 0 : index
    %c0_4 = arith.constant 0 : index
    %5 = vector.load %arg5[%c0_3, %c0_4] : memref<8x128xf32, #tpu.memory_space<vmem>>, vector<8x128xf32>
    %c0_5 = arith.constant 0 : index
    %c0_6 = arith.constant 0 : index
    %6 = vector.load %arg3[%c0_5, %c0_6] : memref<128x512xf32, #tpu.memory_space<vmem>>, vector<128x512xf32>
    %cst = arith.constant dense<0.000000e+00> : vector<8x512xf32>
    %7 = tpu.matmul %5, %6, %cst {dimension_numbers = #tpu.dot_dimension_numbers<[1], [0], [0], [1], [0, 0, 1, 1], [], []>} : vector<8x128xf32>, vector<128x512xf32>, vector<8x512xf32> -> vector<8x512xf32>
    %8 = arith.addf %4, %7 : vector<8x512xf32>
    %9 = vector.extract_strided_slice %8 {offsets = [0, 0], sizes = [8, 128], strides = [1, 1]} : vector<8x512xf32> to vector<8x128xf32>
    %10 = arith.negf %9 : vector<8x128xf32>
    %11 = math.exp %10 : vector<8x128xf32>
    %cst_7 = arith.constant 1.000000e+00 : f32
    %12 = vector.broadcast %cst_7 : f32 to vector<8x128xf32>
    %13 = arith.addf %12, %11 : vector<8x128xf32>
    %14 = arith.divf %12, %13 : vector<8x128xf32>
    %15 = vector.extract_strided_slice %8 {offsets = [0, 128], sizes = [8, 128], strides = [1, 1]} : vector<8x512xf32> to vector<8x128xf32>
    %16 = arith.negf %15 : vector<8x128xf32>
    %17 = math.exp %16 : vector<8x128xf32>
    %cst_8 = arith.constant 1.000000e+00 : f32
    %18 = vector.broadcast %cst_8 : f32 to vector<8x128xf32>
    %19 = arith.addf %18, %17 : vector<8x128xf32>
    %20 = arith.divf %18, %19 : vector<8x128xf32>
    %21 = vector.extract_strided_slice %8 {offsets = [0, 256], sizes = [8, 128], strides = [1, 1]} : vector<8x512xf32> to vector<8x128xf32>
    %22 = math.tanh %21 : vector<8x128xf32>
    %23 = vector.extract_strided_slice %8 {offsets = [0, 384], sizes = [8, 128], strides = [1, 1]} : vector<8x512xf32> to vector<8x128xf32>
    %24 = arith.negf %23 : vector<8x128xf32>
    %25 = math.exp %24 : vector<8x128xf32>
    %cst_9 = arith.constant 1.000000e+00 : f32
    %26 = vector.broadcast %cst_9 : f32 to vector<8x128xf32>
    %27 = arith.addf %26, %25 : vector<8x128xf32>
    %28 = arith.divf %26, %27 : vector<8x128xf32>
    %c0_10 = arith.constant 0 : index
    %c0_11 = arith.constant 0 : index
    %29 = vector.load %arg6[%c0_10, %c0_11] : memref<8x128xf32, #tpu.memory_space<vmem>>, vector<8x128xf32>
    %30 = arith.mulf %20, %29 : vector<8x128xf32>
    %31 = arith.mulf %14, %22 : vector<8x128xf32>
    %32 = arith.addf %30, %31 : vector<8x128xf32>
    %33 = math.tanh %32 : vector<8x128xf32>
    %34 = arith.mulf %28, %33 : vector<8x128xf32>
    %c0_12 = arith.constant 0 : index
    %c0_13 = arith.constant 0 : index
    %35 = vector.load %arg6[%c0_12, %c0_13] : memref<8x128xf32, #tpu.memory_space<vmem>>, vector<8x128xf32>
    tpu.vector_store %arg6[%c0_12, %c0_13], %32 {strides = array<i32>} : memref<8x128xf32, #tpu.memory_space<vmem>>, vector<8x128xf32>,
    %c0_14 = arith.constant 0 : index
    %c0_15 = arith.constant 0 : index
    %36 = vector.load %arg5[%c0_14, %c0_15] : memref<8x128xf32, #tpu.memory_space<vmem>>, vector<8x128xf32>
    tpu.vector_store %arg5[%c0_14, %c0_15], %34 {strides = array<i32>} : memref<8x128xf32, #tpu.memory_space<vmem>>, vector<8x128xf32>,
    %c0_16 = arith.constant 0 : index
    %c0_17 = arith.constant 0 : index
    %c0_18 = arith.constant 0 : index
    %37 = vector.load %arg4[%c0_16, %c0_17, %c0_18] : memref<1x8x128xf32, #tpu.memory_space<vmem>>, vector<1x8x128xf32>
    %38 = vector.shape_cast %37 : vector<1x8x128xf32> to vector<8x128xf32>
    %39 = vector.shape_cast %34 : vector<8x128xf32> to vector<1x8x128xf32>
    tpu.vector_store %arg4[%c0_16, %c0_17, %c0_18], %39 {strides = array<i32>} : memref<1x8x128xf32, #tpu.memory_space<vmem>>, vector<1x8x128xf32>,
    return
  }
  func.func @transform_0(%arg0: i32, %arg1: i32) -> (i32, i32, i32) {
    %c0_i32 = arith.constant 0 : i32
    %c0_i32_0 = arith.constant 0 : i32
    return %arg1, %arg0, %c0_i32 : i32, i32, i32
  }
  func.func @transform_1(%arg0: i32, %arg1: i32) -> (i32, i32) {
    %c0_i32 = arith.constant 0 : i32
    %c0_i32_0 = arith.constant 0 : i32
    %c0_i32_1 = arith.constant 0 : i32
    return %c0_i32, %c0_i32_0 : i32, i32
  }
  func.func @transform_2(%arg0: i32, %arg1: i32) -> (i32, i32, i32) {
    %c0_i32 = arith.constant 0 : i32
    %c0_i32_0 = arith.constant 0 : i32
    return %arg1, %arg0, %c0_i32 : i32, i32, i32
  }
}

module attributes {stable_mosaic.version = 11 : i64} {
  func.func @_matmul_bias_kernel(%arg0: i32, %arg1: i32, %arg2: memref<72x128xf32, #tpu.memory_space<vmem>>, %arg3: memref<128x128xf32, #tpu.memory_space<vmem>>, %arg4: memref<1x128xf32, #tpu.memory_space<vmem>>, %arg5: memref<72x128xf32, #tpu.memory_space<vmem>>) attributes {dimension_semantics = [#tpu.dimension_semantics<parallel>, #tpu.dimension_semantics<parallel>], iteration_bounds = array<i64: 1, 1>, scalar_prefetch = 0 : i64, scratch_operands = 0 : i64, tpu.core_type = #tpu.core_type<tc>, window_params = [{transform_indices = @transform_0, window_bounds = array<i64: 72, 128>}, {transform_indices = @transform_1, window_bounds = array<i64: 128, 128>}, {transform_indices = @transform_2, window_bounds = array<i64: 1, 128>}, {transform_indices = @transform_3, window_bounds = array<i64: 72, 128>}]} {
    %c0 = arith.constant 0 : index
    %c0_0 = arith.constant 0 : index
    %0 = vector.load %arg2[%c0, %c0_0] : memref<72x128xf32, #tpu.memory_space<vmem>>, vector<72x128xf32>
    %c0_1 = arith.constant 0 : index
    %c0_2 = arith.constant 0 : index
    %1 = vector.load %arg3[%c0_1, %c0_2] : memref<128x128xf32, #tpu.memory_space<vmem>>, vector<128x128xf32>
    %cst = arith.constant dense<0.000000e+00> : vector<72x128xf32>
    %2 = tpu.matmul %0, %1, %cst {dimension_numbers = #tpu.dot_dimension_numbers<[1], [0], [0], [1], [0, 0, 1, 1], [], []>} : vector<72x128xf32>, vector<128x128xf32>, vector<72x128xf32> -> vector<72x128xf32>
    %c0_3 = arith.constant 0 : index
    %c0_4 = arith.constant 0 : index
    %3 = vector.load %arg4[%c0_3, %c0_4] : memref<1x128xf32, #tpu.memory_space<vmem>>, vector<1x128xf32>
    %4 = vector.broadcast %3 : vector<1x128xf32> to vector<72x128xf32>
    %5 = arith.addf %2, %4 : vector<72x128xf32>
    %c0_5 = arith.constant 0 : index
    %c0_6 = arith.constant 0 : index
    %6 = vector.load %arg5[%c0_5, %c0_6] : memref<72x128xf32, #tpu.memory_space<vmem>>, vector<72x128xf32>
    tpu.vector_store %arg5[%c0_5, %c0_6], %5 {strides = array<i32>} : memref<72x128xf32, #tpu.memory_space<vmem>>, vector<72x128xf32>,
    return
  }
  func.func @transform_0(%arg0: i32, %arg1: i32) -> (i32, i32) {
    %c0_i32 = arith.constant 0 : i32
    %c0_i32_0 = arith.constant 0 : i32
    return %arg1, %c0_i32 : i32, i32
  }
  func.func @transform_1(%arg0: i32, %arg1: i32) -> (i32, i32) {
    %c0_i32 = arith.constant 0 : i32
    %c0_i32_0 = arith.constant 0 : i32
    return %c0_i32, %arg0 : i32, i32
  }
  func.func @transform_2(%arg0: i32, %arg1: i32) -> (i32, i32) {
    %c0_i32 = arith.constant 0 : i32
    %c0_i32_0 = arith.constant 0 : i32
    return %c0_i32, %arg0 : i32, i32
  }
  func.func @transform_3(%arg0: i32, %arg1: i32) -> (i32, i32) {
    %c0_i32 = arith.constant 0 : i32
    return %arg1, %arg0 : i32, i32
  }
}

</mosaic_0001>

<bundles_post_ra>
// kernel: caption_generator_forward.5
= control target key start
LH: loop header
LB: loop body
LE: loop exit
PB: predicated region body
PF: predicated region fallthrough
CT: control target
= control target key end

     0   :  { %v288_v0 = vmov 0.0   ;;  %vm289_vm0 = vmmov 0   ;;  %s465_s1 = inlined_call_operand.vmem [shape: f32[128,128], index: 1, kind: input, shape index: {}]   ;;  %s466_s0 = inlined_call_operand.vmem [shape: f32[72,128], index: 0, kind: input, shape index: {}]   ;;  %s467_s2 = inlined_call_operand.vmem [shape: f32[1,128], index: 2, kind: input, shape index: {}]   ;;  %s468_s3 = inlined_call_operand.vmem [shape: f32[72,128], index: 3, kind: output, shape index: {}]  }
   0x1   :  { %195 = vmatprep.subr.mxu0 %v288_v0  ;;  %v38_v1 = vld [vmem:[%s465_s1 + $0x78] sm:$0xff]  ;;  %254 = vmatprep.subr.mxu1 %v288_v0  ;;  %v37_v2 = vld [vmem:[%s465_s1 + $0x70] sm:$0xff]  ;;  %v36_v3 = vld [vmem:[%s465_s1 + $0x68] sm:$0xff] }
   0x2   :  { %196 = vmatpush3.msra.mxu0 %v38_v1  ;;  %270 = vmatpush3.msra.mxu1 %v38_v1  ;;  %v35_v4 = vld [vmem:[%s465_s1 + $0x60] sm:$0xff]  ;;  %v34_v5 = vld [vmem:[%s465_s1 + $0x58] sm:$0xff]  ;;  %v33_v6 = vld [vmem:[%s465_s1 + $0x50] sm:$0xff] }
   0x3   :  { %197 = vmatprep.subr.mxu0 %v288_v0  ;;  %255 = vmatprep.subr.mxu1 %v288_v0  ;;  %v32_v7 = vld [vmem:[%s465_s1 + $0x48] sm:$0xff]  ;;  %v31_v8 = vld [vmem:[%s465_s1 + $0x40] sm:$0xff]  ;;  %v30_v9 = vld [vmem:[%s465_s1 + $0x38] sm:$0xff] }
   0x4   :  { %198 = vmatpush3.msra.mxu0 %v37_v2  ;;  %271 = vmatpush3.msra.mxu1 %v37_v2  ;;  %v29_v10 = vld [vmem:[%s465_s1 + $0x30] sm:$0xff]  ;;  %v28_v11 = vld [vmem:[%s465_s1 + $0x28] sm:$0xff]  ;;  %v27_v12 = vld [vmem:[%s465_s1 + $0x20] sm:$0xff] }
   0x5   :  { %199 = vmatprep.subr.mxu0 %v288_v0  ;;  %256 = vmatprep.subr.mxu1 %v288_v0  ;;  %v26_v13 = vld [vmem:[%s465_s1 + $0x18] sm:$0xff]  ;;  %v25_v14 = vld [vmem:[%s465_s1 + $0x10] sm:$0xff]  ;;  %v24_v15 = vld [vmem:[%s465_s1 + $0x8] sm:$0xff] }
   0x6   :  { %200 = vmatpush3.msra.mxu0 %v36_v3  ;;  %272 = vmatpush3.msra.mxu1 %v36_v3  ;;  %v23_v16 = vld [vmem:[%s465_s1] sm:$0xff]  ;;  %v19_v18 = vld [vmem:[%s466_s0 + $0x28] sm:$0xff]  ;;  %v20_v20 = vld [vmem:[%s466_s0 + $0x30] sm:$0xff] }
   0x7   :  { %201 = vmatprep.subr.mxu0 %v288_v0  ;;  %257 = vmatprep.subr.mxu1 %v288_v0  ;;  %v14_v17 = vld [vmem:[%s466_s0] sm:$0xff]  ;;  %v15_v19 = vld [vmem:[%s466_s0 + $0x8] sm:$0xff]  ;;  %v16_v21 = vld [vmem:[%s466_s0 + $0x10] sm:$0xff] }
   0x8   :  { %202 = vmatpush3.msra.mxu0 %v35_v4  ;;  %273 = vmatpush3.msra.mxu1 %v35_v4  ;;  %v21_v22 = vld [vmem:[%s466_s0 + $0x38] sm:$0xff]  ;;  %v22_v24 = vld [vmem:[%s466_s0 + $0x40] sm:$0xff] }
   0x9   :  { %203 = vmatprep.subr.mxu0 %v288_v0  ;;  %258 = vmatprep.subr.mxu1 %v288_v0  ;;  %v17_v23 = vld [vmem:[%s466_s0 + $0x18] sm:$0xff]  ;;  %v18_v25 = vld [vmem:[%s466_s0 + $0x20] sm:$0xff] }
   0xa   :  { %204 = vmatpush3.msra.mxu0 %v34_v5  ;;  %274 = vmatpush3.msra.mxu1 %v34_v5  ;;  %v169_v26 = vld [vmem:[%s467_s2] ss:$0 sm:$0xff] }
   0xb   :  { %205 = vmatprep.subr.mxu0 %v288_v0  ;;  %259 = vmatprep.subr.mxu1 %v288_v0 }
   0xc   :  { %206 = vmatpush3.msra.mxu0 %v33_v6  ;;  %275 = vmatpush3.msra.mxu1 %v33_v6 }
   0xd   :  { %207 = vmatprep.subr.mxu0 %v288_v0  ;;  %260 = vmatprep.subr.mxu1 %v288_v0 }
   0xe   :  { %208 = vmatpush3.msra.mxu0 %v32_v7  ;;  %276 = vmatpush3.msra.mxu1 %v32_v7 }
   0xf   :  { %209 = vmatprep.subr.mxu0 %v288_v0  ;;  %261 = vmatprep.subr.mxu1 %v288_v0 }
  0x10   :  { %210 = vmatpush3.msra.mxu0 %v31_v8  ;;  %277 = vmatpush3.msra.mxu1 %v31_v8 }
  0x11   :  { %211 = vmatprep.subr.mxu0 %v288_v0  ;;  %262 = vmatprep.subr.mxu1 %v288_v0 }
  0x12   :  { %212 = vmatpush3.msra.mxu0 %v30_v9  ;;  %278 = vmatpush3.msra.mxu1 %v30_v9 }
  0x13   :  { %213 = vmatprep.subr.mxu0 %v288_v0  ;;  %263 = vmatprep.subr.mxu1 %v288_v0 }
  0x14   :  { %214 = vmatpush3.msra.mxu0 %v29_v10  ;;  %279 = vmatpush3.msra.mxu1 %v29_v10 }
  0x15   :  { %215 = vmatprep.subr.mxu0 %v288_v0  ;;  %264 = vmatprep.subr.mxu1 %v288_v0 }
  0x16   :  { %216 = vmatpush3.msra.mxu0 %v28_v11  ;;  %280 = vmatpush3.msra.mxu1 %v28_v11 }
  0x17   :  { %217 = vmatprep.subr.mxu0 %v288_v0  ;;  %265 = vmatprep.subr.mxu1 %v288_v0 }
  0x18   :  { %218 = vmatpush3.msra.mxu0 %v27_v12  ;;  %281 = vmatpush3.msra.mxu1 %v27_v12 }
  0x19   :  { %219 = vmatprep.subr.mxu0 %v288_v0  ;;  %266 = vmatprep.subr.mxu1 %v288_v0 }
  0x1a   :  { %220 = vmatpush3.msra.mxu0 %v26_v13  ;;  %282 = vmatpush3.msra.mxu1 %v26_v13 }
  0x1b   :  { %221 = vmatprep.subr.mxu0 %v288_v0  ;;  %267 = vmatprep.subr.mxu1 %v288_v0 }
  0x1c   :  { %222 = vmatpush3.msra.mxu0 %v25_v14  ;;  %283 = vmatpush3.msra.mxu1 %v25_v14 }
  0x1d   :  { %223 = vmatprep.subr.mxu0 %v288_v0  ;;  %268 = vmatprep.subr.mxu1 %v288_v0 }
  0x1e   :  { %224 = vmatpush3.msra.mxu0 %v24_v15  ;;  %284 = vmatpush3.msra.mxu1 %v24_v15 }
  0x1f   :  { %225 = vmatprep.subr.mxu0 %v288_v0  ;;  %227 = vmatprep.mubr.msk.f32.mxu0 %vm289_vm0, %v288_v0 }
  0x20   :  { %226 = vmatpush3.msra.mxu0 %v23_v16  ;;  %269 = vmatprep.subr.mxu1 %v288_v0 }
  0x21   :  { %228 = vmatmul.mubr.f32.vlgmr.msra.gmra.mxu0 %v14_v17  ;;  %285 = vmatpush3.msra.mxu1 %v23_v16 }
  0x22   :  { %242 = vmatprep.mubr.msk.f32.mxu1 %vm289_vm0, %v288_v0  ;;  %230 = vmatprep.mubr.msk.f32.mxu0 %vm289_vm0, %v288_v0 }
  0x23   :  { %243 = vmatmul.mubr.f32.vlgmr.msra.gmra.mxu1 %v19_v18 }
  0x24   :  { %245 = vmatprep.mubr.msk.f32.mxu1 %vm289_vm0, %v288_v0 }
  0x25   :  { %231 = vmatmul.mubr.f32.gmra.mxu0 %v15_v19 }
  0x26   :  { %233 = vmatprep.mubr.msk.f32.mxu0 %vm289_vm0, %v288_v0 }
  0x27   :  { %246 = vmatmul.mubr.f32.gmra.mxu1 %v20_v20 }
  0x28   :  { %248 = vmatprep.mubr.msk.f32.mxu1 %vm289_vm0, %v288_v0 }
  0x29   :  { %234 = vmatmul.mubr.f32.gmra.mxu0 %v16_v21 }
  0x2a   :  { %236 = vmatprep.mubr.msk.f32.mxu0 %vm289_vm0, %v288_v0 }
  0x2b   :  { %249 = vmatmul.mubr.f32.gmra.mxu1 %v21_v22 }
  0x2c   :  { %251 = vmatprep.mubr.msk.f32.mxu1 %vm289_vm0, %v288_v0 }
  0x2d   :  { %237 = vmatmul.mubr.f32.gmra.mxu0 %v17_v23 }
  0x2e   :  { %239 = vmatprep.mubr.msk.f32.mxu0 %vm289_vm0, %v288_v0 }
  0x2f   :  { %252 = vmatmul.mubr.f32.gmra.mxu1 %v22_v24 }
  0x31   :  { %240 = vmatmul.mubr.f32.gmra.mxu0 %v18_v25 }
  0xe1   :  { %v112_v27 = vpop.f32.mrf.mxu0 }
  0xe2   :  { %v113_v28 = vadd.f32 %v169_v26, %v112_v27 }
  0xe3   :  { %v229_v29 = vpop.f32.mrf.mxu0  ;;  %v137_v30 = vpop.f32.mrf.mxu1 }
  0xe4   :  { %156 = vst [vmem:[%s468_s3] sm:$0xff] %v113_v28  ;;  %v138_v31 = vadd.f32 %v169_v26, %v137_v30 }
  0xe5   :  { %v117_v32 = vpop.f32.mrf.mxu0  ;;  %v244_v33 = vpop.f32.mrf.mxu1 }
  0xe6   :  { %161 = vst [vmem:[%s468_s3 + $0x28] sm:$0xff] %v138_v31  ;;  %v118_v34 = vadd.f32 %v169_v26, %v117_v32 }
  0xe7   :  { %v232_v35 = vpop.f32.mrf.mxu0  ;;  %v142_v36 = vpop.f32.mrf.mxu1 }
  0xe8   :  { %157 = vst [vmem:[%s468_s3 + $0x8] sm:$0xff] %v118_v34  ;;  %v143_v37 = vadd.f32 %v169_v26, %v142_v36 }
  0xe9   :  { %v122_v38 = vpop.f32.mrf.mxu0  ;;  %v247_v39 = vpop.f32.mrf.mxu1 }
  0xea   :  { %162 = vst [vmem:[%s468_s3 + $0x30] sm:$0xff] %v143_v37  ;;  %v123_v40 = vadd.f32 %v169_v26, %v122_v38 }
  0xeb   :  { %v235_v41 = vpop.f32.mrf.mxu0  ;;  %v147_v42 = vpop.f32.mrf.mxu1 }
  0xec   :  { %158 = vst [vmem:[%s468_s3 + $0x10] sm:$0xff] %v123_v40  ;;  %v148_v43 = vadd.f32 %v169_v26, %v147_v42 }
  0xed   :  { %v127_v44 = vpop.f32.mrf.mxu0  ;;  %v250_v45 = vpop.f32.mrf.mxu1 }
  0xee   :  { %163 = vst [vmem:[%s468_s3 + $0x38] sm:$0xff] %v148_v43  ;;  %v128_v46 = vadd.f32 %v169_v26, %v127_v44 }
  0xef   :  { %v238_v47 = vpop.f32.mrf.mxu0  ;;  %v152_v48 = vpop.f32.mrf.mxu1 }
  0xf0   :  { %159 = vst [vmem:[%s468_s3 + $0x18] sm:$0xff] %v128_v46  ;;  %v153_v49 = vadd.f32 %v169_v26, %v152_v48 }
  0xf1   :  { %v132_v50 = vpop.f32.mrf.mxu0  ;;  %v253_v51 = vpop.f32.mrf.mxu1 }
  0xf2   :  { %164 = vst [vmem:[%s468_s3 + $0x40] sm:$0xff] %v153_v49  ;;  %v133_v52 = vadd.f32 %v169_v26, %v132_v50 }
  0xf3   :  { %v241_v53 = vpop.f32.mrf.mxu0 }
  0xf4   :  { %160 = vst [vmem:[%s468_s3 + $0x20] sm:$0xff] %v133_v52 }

// kernel: caption_generator_forward.3
= control target key start
LH: loop header
LB: loop body
LE: loop exit
PB: predicated region body
PF: predicated region fallthrough
CT: control target
= control target key end

     0   :  { %8 = vsyncpa [#allocation3], 0  ;;  %s708_s0 = inlined_call_operand.vmem [shape: f32[72,32], index: 0, kind: input, shape index: {}]   ;;  %s709_s1 = inlined_call_operand.hbm [shape: f32[32,512], index: 1, kind: input, shape index: {}]   ;;  %s710_s2 = inlined_call_operand.hbm [shape: f32[1,512], index: 2, kind: input, shape index: {}]   ;;  %s711_s3 = inlined_call_operand.vmem [shape: f32[72,512], index: 3, kind: output, shape index: {}]  }
   0x1   :  { %9 = vsyncpa [#allocation5], 0  ;;  %s462_s12 = smov [#allocation2]  }
   0x2   :  { %s17_s13 = sshll.u32 %s462_s12, 4  ;;  %s18_s13 = int_to_ptr.vmem [resolvable:$true] %s17_s13 }
   0x3   :  { %s426_s14 = scalar_lea.vmem %s18_s13, 2048  ;;  %p431_p1 = scmp.lt.s32.totalorder %s18_s13, %s18_s13 }
   0x4   :  { %p427_p0 = scmp.ne.s32.totalorder %s18_s13, %s426_s14  ;;  %p432_p2 = scmp.lt.s32.totalorder %s426_s14, %s426_s14 }
   0x6   :  { %p433_p3 = por %p432_p2, %p431_p1 }
   0x8   :  { %p434_p4 = pnand %p433_p3, %p427_p0 }
   0xa   :  { %437 = shalt.err (!%p434_p4)
}
   0xb   :  { %s463_s15 = smov 512   ;;  %s464_s16 = smov 32  }
   0xc   :  { %23 = dma.hbm_to_vmem [thread:$0]  %s709_s1, 2048, %s18_s13, [#allocation3], %s463_s15, %s463_s15, %s464_s16  }
   0xd   :  { %s465_s19 = smov [#allocation4]  }
   0xe   :  { %s30_s20 = sshll.u32 %s465_s19, 4  ;;  %s31_s20 = int_to_ptr.vmem [resolvable:$true] %s30_s20 }
   0xf   :  { %s446_s21 = scalar_lea.vmem %s31_s20, 64  ;;  %p451_p6 = scmp.lt.s32.totalorder %s31_s20, %s31_s20 }
  0x10   :  { %p447_p5 = scmp.ne.s32.totalorder %s31_s20, %s446_s21  ;;  %p452_p7 = scmp.lt.s32.totalorder %s446_s21, %s446_s21 }
  0x12   :  { %p453_p8 = por %p452_p7, %p451_p6 }
  0x14   :  { %p454_p9 = pnand %p453_p8, %p447_p5 }
  0x16   :  { %457 = shalt.err (!%p454_p9)
}
  0x17   :  { %33 = dma.hbm_to_vmem [thread:$0]  %s710_s2, 64, %s31_s20, [#allocation5]  }
  0x18   :  { %458 = dma.done.wait [#allocation3], 2048  }
  0x19   :  { %459 = vsyncadd [#allocation3], 4294965248 }
  0x1a   :  { %460 = dma.done.wait [#allocation5], 64  }
  0x1b   :  { %461 = vsyncadd [#allocation5], 4294967232  ;;  %v466_v0 = vmov 0.0   ;;  %v62_v1 = vld [vmem:[#allocation2 + $0x68] sm:$0xff]  ;;  %v64_v2 = vld [vmem:[#allocation2 + $0x78] sm:$0xff]  ;;  %vm87_vm0 = vcmask 261120   ;;  %v67_v26 = vlaneseq }
  0x1c   :  { %179 = vmatprep.mubr.f32.mxu0 %v466_v0  ;;  %298 = vmatprep.mubr.f32.mxu1 %v466_v0  ;;  %v61_v3 = vld [vmem:[#allocation2 + $0x60] sm:$0xff]  ;;  %v63_v4 = vld [vmem:[#allocation2 + $0x70] sm:$0xff]  ;;  %v58_v5 = vld [vmem:[#allocation2 + $0x48] sm:$0xff] }
  0x1d   :  { %139 = vmatprep.subr.mxu0 %v62_v1  ;;  %258 = vmatprep.subr.mxu1 %v64_v2  ;;  %v60_v6 = vld [vmem:[#allocation2 + $0x58] sm:$0xff]  ;;  %v57_v7 = vld [vmem:[#allocation2 + $0x40] sm:$0xff]  ;;  %v59_v8 = vld [vmem:[#allocation2 + $0x50] sm:$0xff]  ;;  %v68_v27 = vshrl.u32 %v67_v26, 7 }
  0x1e   :  { %140 = vmatpush1.msra.mxu0 %v61_v3  ;;  %259 = vmatpush1.msra.mxu1 %v63_v4  ;;  %v54_v9 = vld [vmem:[#allocation2 + $0x28] sm:$0xff]  ;;  %v56_v10 = vld [vmem:[#allocation2 + $0x38] sm:$0xff]  ;;  %v53_v11 = vld [vmem:[#allocation2 + $0x20] sm:$0xff] }
  0x1f   :  { %141 = vmatprep.subr.mxu0 %v58_v5  ;;  %260 = vmatprep.subr.mxu1 %v60_v6  ;;  %v55_v12 = vld [vmem:[#allocation2 + $0x30] sm:$0xff]  ;;  %v50_v13 = vld [vmem:[#allocation2 + $0x8] sm:$0xff]  ;;  %v52_v14 = vld [vmem:[#allocation2 + $0x18] sm:$0xff]  ;;  %v69_v28 = vsub.s32 0, %v68_v27  ;;  %v77_v29 = vsub.s32 2, %v68_v27  ;;  %v73_v31 = vsub.s32 1, %v68_v27 }
  0x20   :  { %142 = vmatpush1.msra.mxu0 %v57_v7  ;;  %261 = vmatpush1.msra.mxu1 %v59_v8  ;;  %v49_v15 = vld [vmem:[#allocation2] sm:$0xff]  ;;  %v51_v16 = vld [vmem:[#allocation2 + $0x10] sm:$0xff]  ;;  %v41_v18 = vld [vmem:[%s708_s0 + $0x8] sm:$0xff]  ;;  %v81_v32 = vsub.s32 3, %v68_v27 }
  0x21   :  { %143 = vmatprep.subr.mxu0 %v54_v9  ;;  %262 = vmatprep.subr.mxu1 %v56_v10  ;;  %v40_v17 = vld [vmem:[%s708_s0] sm:$0xff]  ;;  %v42_v19 = vld [vmem:[%s708_s0 + $0x10] sm:$0xff]  ;;  %v43_v20 = vld [vmem:[%s708_s0 + $0x18] sm:$0xff] }
  0x22   :  { %144 = vmatpush1.msra.mxu0 %v53_v11  ;;  %263 = vmatpush1.msra.mxu1 %v55_v12  ;;  %v44_v21 = vld [vmem:[%s708_s0 + $0x20] sm:$0xff]  ;;  %v45_v22 = vld [vmem:[%s708_s0 + $0x28] sm:$0xff]  ;;  %v46_v23 = vld [vmem:[%s708_s0 + $0x30] sm:$0xff] }
  0x23   :  { %145 = vmatprep.subr.mxu0 %v50_v13  ;;  %264 = vmatprep.subr.mxu1 %v52_v14  ;;  %v47_v24 = vld [vmem:[%s708_s0 + $0x38] sm:$0xff]  ;;  %v48_v25 = vld [vmem:[%s708_s0 + $0x40] sm:$0xff] }
  0x24   :  { %146 = vmatpush1.msra.mxu0 %v49_v15  ;;  %265 = vmatpush1.msra.mxu1 %v51_v16  ;;  %v65_v30 = vld [vmem:[#allocation4] sm:$0xf] }
  0x25   :  { %395 = vmatmul.mubr.msk.f32.vlgmr.msra.gmra.mxu0 %vm87_vm0, %v40_v17  ;;  %404 = vmatmul.mubr.msk.f32.vlgmr.msra.gmra.mxu1 %vm87_vm0, %v40_v17  ;;  %v556_v33 = vrot.slane %v65_v30, %v69_v28  ;;  %v558_v34 = vrot.slane %v65_v30, %v77_v29  ;;  %v560_v35 = vrot.slane %v65_v30, %v73_v31 }
  0x26   :  { %185 = vmatprep.mubr.f32.mxu0 %v466_v0  ;;  %304 = vmatprep.mubr.f32.mxu1 %v466_v0  ;;  %v562_v36 = vrot.slane %v65_v30, %v81_v32 }
  0x29   :  { %396 = vmatmul.mubr.msk.f32.gmra.mxu0 %vm87_vm0, %v41_v18  ;;  %405 = vmatmul.mubr.msk.f32.gmra.mxu1 %vm87_vm0, %v41_v18 }
  0x2a   :  { %191 = vmatprep.mubr.f32.mxu0 %v466_v0  ;;  %310 = vmatprep.mubr.f32.mxu1 %v466_v0 }
  0x2d   :  { %397 = vmatmul.mubr.msk.f32.gmra.mxu0 %vm87_vm0, %v42_v19  ;;  %406 = vmatmul.mubr.msk.f32.gmra.mxu1 %vm87_vm0, %v42_v19 }
  0x2e   :  { %197 = vmatprep.mubr.f32.mxu0 %v466_v0  ;;  %316 = vmatprep.mubr.f32.mxu1 %v466_v0 }
  0x31   :  { %398 = vmatmul.mubr.msk.f32.gmra.mxu0 %vm87_vm0, %v43_v20  ;;  %407 = vmatmul.mubr.msk.f32.gmra.mxu1 %vm87_vm0, %v43_v20 }
  0x32   :  { %203 = vmatprep.mubr.f32.mxu0 %v466_v0  ;;  %322 = vmatprep.mubr.f32.mxu1 %v466_v0 }
  0x35   :  { %399 = vmatmul.mubr.msk.f32.gmra.mxu0 %vm87_vm0, %v44_v21  ;;  %408 = vmatmul.mubr.msk.f32.gmra.mxu1 %vm87_vm0, %v44_v21 }
  0x36   :  { %209 = vmatprep.mubr.f32.mxu0 %v466_v0  ;;  %328 = vmatprep.mubr.f32.mxu1 %v466_v0 }
  0x39   :  { %400 = vmatmul.mubr.msk.f32.gmra.mxu0 %vm87_vm0, %v45_v22  ;;  %409 = vmatmul.mubr.msk.f32.gmra.mxu1 %vm87_vm0, %v45_v22 }
  0x3a   :  { %215 = vmatprep.mubr.f32.mxu0 %v466_v0  ;;  %334 = vmatprep.mubr.f32.mxu1 %v466_v0 }
  0x3d   :  { %401 = vmatmul.mubr.msk.f32.gmra.mxu0 %vm87_vm0, %v46_v23  ;;  %410 = vmatmul.mubr.msk.f32.gmra.mxu1 %vm87_vm0, %v46_v23 }
  0x3e   :  { %221 = vmatprep.mubr.f32.mxu0 %v466_v0  ;;  %340 = vmatprep.mubr.f32.mxu1 %v466_v0 }
  0x41   :  { %402 = vmatmul.mubr.msk.f32.gmra.mxu0 %vm87_vm0, %v47_v24  ;;  %411 = vmatmul.mubr.msk.f32.gmra.mxu1 %vm87_vm0, %v47_v24 }
  0x42   :  { %227 = vmatprep.mubr.f32.mxu0 %v466_v0  ;;  %346 = vmatprep.mubr.f32.mxu1 %v466_v0 }
  0x45   :  { %403 = vmatmul.mubr.msk.f32.gmra.mxu0 %vm87_vm0, %v48_v25  ;;  %412 = vmatmul.mubr.msk.f32.gmra.mxu1 %vm87_vm0, %v48_v25 }
  0xe5   :  { %v181_v37 = vpop.f32.mrf.mxu0  ;;  %v300_v38 = vpop.f32.mrf.mxu1 }
  0xe6   :  { %v182_v39 = vadd.f32 %v181_v37, %v556_v33  ;;  %v301_v40 = vadd.f32 %v300_v38, %v558_v34 }
  0xe7   :  { %v183_v41 = vpop.f32.mrf.mxu0  ;;  %v302_v42 = vpop.f32.mrf.mxu1 }
  0xe8   :  { %353 = vst [vmem:[%s711_s3] sm:$0xff] %v182_v39  ;;  %355 = vst [vmem:[%s711_s3 + $0x10] sm:$0xff] %v301_v40  ;;  %v184_v43 = vadd.f32 %v183_v41, %v560_v35  ;;  %v303_v44 = vadd.f32 %v302_v42, %v562_v36 }
  0xe9   :  { %v187_v45 = vpop.f32.mrf.mxu0  ;;  %v306_v46 = vpop.f32.mrf.mxu1 }
  0xea   :  { %354 = vst [vmem:[%s711_s3 + $0x8] sm:$0xff] %v184_v43  ;;  %356 = vst [vmem:[%s711_s3 + $0x18] sm:$0xff] %v303_v44  ;;  %v188_v47 = vadd.f32 %v187_v45, %v556_v33  ;;  %v307_v48 = vadd.f32 %v306_v46, %v558_v34 }
  0xeb   :  { %v189_v49 = vpop.f32.mrf.mxu0  ;;  %v308_v50 = vpop.f32.mrf.mxu1 }
  0xec   :  { %357 = vst [vmem:[%s711_s3 + $0x20] sm:$0xff] %v188_v47  ;;  %359 = vst [vmem:[%s711_s3 + $0x30] sm:$0xff] %v307_v48  ;;  %v190_v51 = vadd.f32 %v189_v49, %v560_v35  ;;  %v309_v52 = vadd.f32 %v308_v50, %v562_v36 }
  0xed   :  { %v193_v53 = vpop.f32.mrf.mxu0  ;;  %v312_v54 = vpop.f32.mrf.mxu1 }
  0xee   :  { %358 = vst [vmem:[%s711_s3 + $0x28] sm:$0xff] %v190_v51  ;;  %360 = vst [vmem:[%s711_s3 + $0x38] sm:$0xff] %v309_v52  ;;  %v194_v55 = vadd.f32 %v193_v53, %v556_v33  ;;  %v313_v56 = vadd.f32 %v312_v54, %v558_v34 }
  0xef   :  { %v195_v57 = vpop.f32.mrf.mxu0  ;;  %v314_v58 = vpop.f32.mrf.mxu1 }
  0xf0   :  { %361 = vst [vmem:[%s711_s3 + $0x40] sm:$0xff] %v194_v55  ;;  %363 = vst [vmem:[%s711_s3 + $0x50] sm:$0xff] %v313_v56  ;;  %v196_v59 = vadd.f32 %v195_v57, %v560_v35  ;;  %v315_v60 = vadd.f32 %v314_v58, %v562_v36 }
  0xf1   :  { %v199_v61 = vpop.f32.mrf.mxu0  ;;  %v318_v62 = vpop.f32.mrf.mxu1 }
  0xf2   :  { %362 = vst [vmem:[%s711_s3 + $0x48] sm:$0xff] %v196_v59  ;;  %364 = vst [vmem:[%s711_s3 + $0x58] sm:$0xff] %v315_v60  ;;  %v200_v63 = vadd.f32 %v199_v61, %v556_v33  ;;  %v319_v0 = vadd.f32 %v318_v62, %v558_v34 }
  0xf3   :  { %v201_v1 = vpop.f32.mrf.mxu0  ;;  %v320_v2 = vpop.f32.mrf.mxu1 }
  0xf4   :  { %365 = vst [vmem:[%s711_s3 + $0x60] sm:$0xff] %v200_v63  ;;  %367 = vst [vmem:[%s711_s3 + $0x70] sm:$0xff] %v319_v0  ;;  %v202_v3 = vadd.f32 %v201_v1, %v560_v35  ;;  %v321_v4 = vadd.f32 %v320_v2, %v562_v36 }
  0xf5   :  { %v205_v5 = vpop.f32.mrf.mxu0  ;;  %v324_v6 = vpop.f32.mrf.mxu1 }
  0xf6   :  { %366 = vst [vmem:[%s711_s3 + $0x68] sm:$0xff] %v202_v3  ;;  %368 = vst [vmem:[%s711_s3 + $0x78] sm:$0xff] %v321_v4  ;;  %v206_v7 = vadd.f32 %v205_v5, %v556_v33  ;;  %v325_v8 = vadd.f32 %v324_v6, %v558_v34 }
  0xf7   :  { %v207_v9 = vpop.f32.mrf.mxu0  ;;  %v326_v10 = vpop.f32.mrf.mxu1 }
  0xf8   :  { %369 = vst [vmem:[%s711_s3 + $0x80] sm:$0xff] %v206_v7  ;;  %371 = vst [vmem:[%s711_s3 + $0x90] sm:$0xff] %v325_v8  ;;  %v208_v11 = vadd.f32 %v207_v9, %v560_v35  ;;  %v327_v12 = vadd.f32 %v326_v10, %v562_v36 }
  0xf9   :  { %v211_v13 = vpop.f32.mrf.mxu0  ;;  %v330_v14 = vpop.f32.mrf.mxu1 }
  0xfa   :  { %370 = vst [vmem:[%s711_s3 + $0x88] sm:$0xff] %v208_v11  ;;  %372 = vst [vmem:[%s711_s3 + $0x98] sm:$0xff] %v327_v12  ;;  %v212_v15 = vadd.f32 %v211_v13, %v556_v33  ;;  %v331_v16 = vadd.f32 %v330_v14, %v558_v34 }
  0xfb   :  { %v213_v17 = vpop.f32.mrf.mxu0  ;;  %v332_v18 = vpop.f32.mrf.mxu1 }
  0xfc   :  { %373 = vst [vmem:[%s711_s3 + $0xa0] sm:$0xff] %v212_v15  ;;  %375 = vst [vmem:[%s711_s3 + $0xb0] sm:$0xff] %v331_v16  ;;  %v214_v19 = vadd.f32 %v213_v17, %v560_v35  ;;  %v333_v20 = vadd.f32 %v332_v18, %v562_v36 }
  0xfd   :  { %v217_v21 = vpop.f32.mrf.mxu0  ;;  %v336_v22 = vpop.f32.mrf.mxu1 }
  0xfe   :  { %374 = vst [vmem:[%s711_s3 + $0xa8] sm:$0xff] %v214_v19  ;;  %376 = vst [vmem:[%s711_s3 + $0xb8] sm:$0xff] %v333_v20  ;;  %v218_v23 = vadd.f32 %v217_v21, %v556_v33  ;;  %v337_v24 = vadd.f32 %v336_v22, %v558_v34 }
  0xff   :  { %v219_v25 = vpop.f32.mrf.mxu0  ;;  %v338_v26 = vpop.f32.mrf.mxu1 }
 0x100   :  { %377 = vst [vmem:[%s711_s3 + $0xc0] sm:$0xff] %v218_v23  ;;  %379 = vst [vmem:[%s711_s3 + $0xd0] sm:$0xff] %v337_v24  ;;  %v220_v27 = vadd.f32 %v219_v25, %v560_v35  ;;  %v339_v28 = vadd.f32 %v338_v26, %v562_v36 }
 0x101   :  { %v223_v29 = vpop.f32.mrf.mxu0  ;;  %v342_v30 = vpop.f32.mrf.mxu1 }
 0x102   :  { %378 = vst [vmem:[%s711_s3 + $0xc8] sm:$0xff] %v220_v27  ;;  %380 = vst [vmem:[%s711_s3 + $0xd8] sm:$0xff] %v339_v28  ;;  %v224_v31 = vadd.f32 %v223_v29, %v556_v33  ;;  %v343_v32 = vadd.f32 %v342_v30, %v558_v34 }
 0x103   :  { %v225_v37 = vpop.f32.mrf.mxu0  ;;  %v344_v38 = vpop.f32.mrf.mxu1 }
 0x104   :  { %381 = vst [vmem:[%s711_s3 + $0xe0] sm:$0xff] %v224_v31  ;;  %383 = vst [vmem:[%s711_s3 + $0xf0] sm:$0xff] %v343_v32  ;;  %v226_v39 = vadd.f32 %v225_v37, %v560_v35  ;;  %v345_v40 = vadd.f32 %v344_v38, %v562_v36 }
 0x105   :  { %v229_v41 = vpop.f32.mrf.mxu0  ;;  %v348_v42 = vpop.f32.mrf.mxu1 }
 0x106   :  { %382 = vst [vmem:[%s711_s3 + $0xe8] sm:$0xff] %v226_v39  ;;  %384 = vst [vmem:[%s711_s3 + $0xf8] sm:$0xff] %v345_v40  ;;  %v230_v43 = vadd.f32 %v229_v41, %v556_v33  ;;  %v349_v44 = vadd.f32 %v348_v42, %v558_v34 }
 0x107   :  { %v231_v45 = vpop.f32.mrf.mxu0  ;;  %v350_v46 = vpop.f32.mrf.mxu1 }
 0x108   :  { %385 = vst [vmem:[%s711_s3 + $0x100] sm:$0xff] %v230_v43  ;;  %387 = vst [vmem:[%s711_s3 + $0x110] sm:$0xff] %v349_v44  ;;  %v232_v47 = vadd.f32 %v231_v45, %v560_v35  ;;  %v351_v48 = vadd.f32 %v350_v46, %v562_v36 }
 0x10a   :  { %386 = vst [vmem:[%s711_s3 + $0x108] sm:$0xff] %v232_v47  ;;  %388 = vst [vmem:[%s711_s3 + $0x118] sm:$0xff] %v351_v48 }
 0x10b   :  { %393 = vsyncpa [#allocation3], 1 }
 0x10c   :  { %394 = vsyncpa [#allocation5], 1 }

// kernel: caption_generator_forward.4
= control target key start
LH: loop header
LB: loop body
LE: loop exit
PB: predicated region body
PF: predicated region fallthrough
CT: control target
= control target key end

     0   :  { %s603_s9 = smov 0   ;;  %s605_s10 = smov 0   ;;  %s837_s0 = inlined_call_operand.vmem [shape: f32[9,8,512], index: 0, kind: input, shape index: {}]   ;;  %s838_s1 = inlined_call_operand.vmem [shape: f32[128,512], index: 1, kind: input, shape index: {}]   ;;  %s839_s2 = inlined_call_operand.vmem [shape: f32[9,8,128], index: 2, kind: output, shape index: {}]  }
   0x1   :  { %s607_s11 = smov 0  }
   0x2 LB: > { %s21_s12 = sadd.s32 1, %s580_s10  ;;  %p509_p0 = scmp.ge.s32.totalorder %s584_s11, 1  ;;  %s584_s11 = sphi %s607_s11, %s12_s11   ;;  %s580_s10 = sphi %s605_s10, %s841_s10   ;;  %s576_s9 = sphi %s603_s9, %s840_s9  }
   0x3   : > { %p22_p1 = scmp.ge.s32.totalorder %s21_s12, 9  ;;  %p132_p2 = scmp.lt.s32.totalorder %s584_s11, 10 }
   0x5   : > { %s843_s12 = smov (%p22_p1, %s21_s12), 0  ;;  %p133_p3 = pnand %p509_p0, %p132_p2 }
   0x6   : > { %p160_p4 = scmp.lt.s32.totalorder (!%p133_p3), %s576_s9, 8  ;;  %p513_p5 = scmp.ne.s32.totalorder (!%p133_p3), %s576_s9, 0 }
   0x7   : > { %136 = sbr.rel (%p133_p3) target bundleno = 303 (0x12f), region = 28 }
   0xc   : > { %s161_s13 = scalar_select %p160_p4, %s576_s9, 8 }
   0xd   : > { %179 = sbr.rel (%p513_p5) target bundleno = 20 (0x14), region = 32 }
   0xe   : > { %s519_s14 = sshll.u32 %s161_s13, 5  ;;  %s512_s15 = sshll.u32 %s161_s13, 3 }
   0xf   : > { %s624_s18 = scalar_lea.vmem %s837_s0, %s519_s14  ;;  %s629_s21 = scalar_lea.vmem %s839_s2, %s512_s15 }
  0x12   : > { %v586_v0 = vmov 0.0  }
  0x13   : > { %180 = vst [vmem:[#allocation2] sm:$0xff] %v586_v0  ;;  %181 = vst [vmem:[#allocation3] sm:$0xff] %v586_v0 }
  0x14 PF: > { %v248_v1 = vld [vmem:[%s838_s1 + $0x1e8] sm:$0xff]  ;;  %v247_v2 = vld [vmem:[%s838_s1 + $0x1e0] sm:$0xff]  ;;  %v587_v5 = vmov 0.0   ;;  %v250_v10 = vld [vmem:[%s838_s1 + $0x1f8] sm:$0xff] }
  0x15   : > { %v244_v3 = vld [vmem:[%s838_s1 + $0x1c8] sm:$0xff]  ;;  %251 = vmatprep.subr.mxu0 %v248_v1  ;;  %v243_v4 = vld [vmem:[%s838_s1 + $0x1c0] sm:$0xff]  ;;  %315 = vmatprep.mubr.f32.mxu0 %v587_v5  ;;  %v249_v12 = vld [vmem:[%s838_s1 + $0x1f0] sm:$0xff] }
  0x16   : > { %252 = vmatpush1.msra.mxu0 %v247_v2  ;;  %v240_v6 = vld [vmem:[%s838_s1 + $0x1a8] sm:$0xff]  ;;  %386 = vmatprep.mubr.f32.mxu1 %v587_v5  ;;  %v239_v7 = vld [vmem:[%s838_s1 + $0x1a0] sm:$0xff]  ;;  %v246_v14 = vld [vmem:[%s838_s1 + $0x1d8] sm:$0xff] }
  0x17   : > { %253 = vmatprep.subr.mxu0 %v244_v3  ;;  %v236_v8 = vld [vmem:[%s838_s1 + $0x188] sm:$0xff]  ;;  %v235_v9 = vld [vmem:[%s838_s1 + $0x180] sm:$0xff]  ;;  %322 = vmatprep.subr.mxu1 %v250_v10  ;;  %v245_v15 = vld [vmem:[%s838_s1 + $0x1d0] sm:$0xff] }
  0x18   : > { %254 = vmatpush1.msra.mxu0 %v243_v4  ;;  %v232_v11 = vld [vmem:[%s838_s1 + $0x168] sm:$0xff]  ;;  %v231_v13 = vld [vmem:[%s838_s1 + $0x160] sm:$0xff]  ;;  %323 = vmatpush1.msra.mxu1 %v249_v12  ;;  %v242_v17 = vld [vmem:[%s838_s1 + $0x1b8] sm:$0xff] }
  0x19   : > { %255 = vmatprep.subr.mxu0 %v240_v6  ;;  %v228_v16 = vld [vmem:[%s838_s1 + $0x148] sm:$0xff]  ;;  %324 = vmatprep.subr.mxu1 %v246_v14  ;;  %v227_v18 = vld [vmem:[%s838_s1 + $0x140] sm:$0xff]  ;;  %v241_v19 = vld [vmem:[%s838_s1 + $0x1b0] sm:$0xff] }
  0x1a   : > { %256 = vmatpush1.msra.mxu0 %v239_v7  ;;  %325 = vmatpush1.msra.mxu1 %v245_v15  ;;  %v238_v20 = vld [vmem:[%s838_s1 + $0x198] sm:$0xff]  ;;  %v224_v21 = vld [vmem:[%s838_s1 + $0x128] sm:$0xff]  ;;  %v237_v22 = vld [vmem:[%s838_s1 + $0x190] sm:$0xff] }
  0x1b   : > { %257 = vmatprep.subr.mxu0 %v236_v8  ;;  %326 = vmatprep.subr.mxu1 %v242_v17  ;;  %v223_v23 = vld [vmem:[%s838_s1 + $0x120] sm:$0xff]  ;;  %v234_v24 = vld [vmem:[%s838_s1 + $0x178] sm:$0xff]  ;;  %v220_v25 = vld [vmem:[%s838_s1 + $0x108] sm:$0xff] }
  0x1c   : > { %258 = vmatpush1.msra.mxu0 %v235_v9  ;;  %327 = vmatpush1.msra.mxu1 %v241_v19  ;;  %v233_v26 = vld [vmem:[%s838_s1 + $0x170] sm:$0xff]  ;;  %v219_v27 = vld [vmem:[%s838_s1 + $0x100] sm:$0xff]  ;;  %v230_v28 = vld [vmem:[%s838_s1 + $0x158] sm:$0xff] }
  0x1d   : > { %259 = vmatprep.subr.mxu0 %v232_v11  ;;  %328 = vmatprep.subr.mxu1 %v238_v20  ;;  %v216_v29 = vld [vmem:[%s838_s1 + $0xe8] sm:$0xff]  ;;  %v229_v30 = vld [vmem:[%s838_s1 + $0x150] sm:$0xff]  ;;  %v215_v31 = vld [vmem:[%s838_s1 + $0xe0] sm:$0xff] }
  0x1e   : > { %260 = vmatpush1.msra.mxu0 %v231_v13  ;;  %329 = vmatpush1.msra.mxu1 %v237_v22  ;;  %v226_v32 = vld [vmem:[%s838_s1 + $0x138] sm:$0xff]  ;;  %v212_v33 = vld [vmem:[%s838_s1 + $0xc8] sm:$0xff]  ;;  %v225_v34 = vld [vmem:[%s838_s1 + $0x130] sm:$0xff] }
  0x1f   : > { %261 = vmatprep.subr.mxu0 %v228_v16  ;;  %330 = vmatprep.subr.mxu1 %v234_v24  ;;  %v211_v35 = vld [vmem:[%s838_s1 + $0xc0] sm:$0xff]  ;;  %v222_v36 = vld [vmem:[%s838_s1 + $0x118] sm:$0xff]  ;;  %v208_v37 = vld [vmem:[%s838_s1 + $0xa8] sm:$0xff] }
  0x20   : > { %262 = vmatpush1.msra.mxu0 %v227_v18  ;;  %331 = vmatpush1.msra.mxu1 %v233_v26  ;;  %v221_v38 = vld [vmem:[%s838_s1 + $0x110] sm:$0xff]  ;;  %v207_v39 = vld [vmem:[%s838_s1 + $0xa0] sm:$0xff]  ;;  %v218_v40 = vld [vmem:[%s838_s1 + $0xf8] sm:$0xff] }
  0x21   : > { %263 = vmatprep.subr.mxu0 %v224_v21  ;;  %332 = vmatprep.subr.mxu1 %v230_v28  ;;  %v204_v41 = vld [vmem:[%s838_s1 + $0x88] sm:$0xff]  ;;  %v217_v42 = vld [vmem:[%s838_s1 + $0xf0] sm:$0xff]  ;;  %v203_v43 = vld [vmem:[%s838_s1 + $0x80] sm:$0xff] }
  0x22   : > { %264 = vmatpush1.msra.mxu0 %v223_v23  ;;  %333 = vmatpush1.msra.mxu1 %v229_v30  ;;  %v214_v44 = vld [vmem:[%s838_s1 + $0xd8] sm:$0xff]  ;;  %v200_v45 = vld [vmem:[%s838_s1 + $0x68] sm:$0xff]  ;;  %v213_v46 = vld [vmem:[%s838_s1 + $0xd0] sm:$0xff] }
  0x23   : > { %265 = vmatprep.subr.mxu0 %v220_v25  ;;  %334 = vmatprep.subr.mxu1 %v226_v32  ;;  %v199_v47 = vld [vmem:[%s838_s1 + $0x60] sm:$0xff]  ;;  %v210_v48 = vld [vmem:[%s838_s1 + $0xb8] sm:$0xff]  ;;  %v196_v49 = vld [vmem:[%s838_s1 + $0x48] sm:$0xff] }
  0x24   : > { %266 = vmatpush1.msra.mxu0 %v219_v27  ;;  %335 = vmatpush1.msra.mxu1 %v225_v34  ;;  %v209_v50 = vld [vmem:[%s838_s1 + $0xb0] sm:$0xff]  ;;  %v195_v51 = vld [vmem:[%s838_s1 + $0x40] sm:$0xff]  ;;  %v206_v52 = vld [vmem:[%s838_s1 + $0x98] sm:$0xff] }
  0x25   : > { %267 = vmatprep.subr.mxu0 %v216_v29  ;;  %336 = vmatprep.subr.mxu1 %v222_v36  ;;  %v192_v53 = vld [vmem:[%s838_s1 + $0x28] sm:$0xff]  ;;  %v205_v54 = vld [vmem:[%s838_s1 + $0x90] sm:$0xff]  ;;  %v191_v55 = vld [vmem:[%s838_s1 + $0x20] sm:$0xff] }
  0x26   : > { %268 = vmatpush1.msra.mxu0 %v215_v31  ;;  %337 = vmatpush1.msra.mxu1 %v221_v38  ;;  %v202_v56 = vld [vmem:[%s838_s1 + $0x78] sm:$0xff]  ;;  %v188_v57 = vld [vmem:[%s838_s1 + $0x8] sm:$0xff]  ;;  %v201_v58 = vld [vmem:[%s838_s1 + $0x70] sm:$0xff] }
  0x27   : > { %269 = vmatprep.subr.mxu0 %v212_v33  ;;  %338 = vmatprep.subr.mxu1 %v218_v40  ;;  %v187_v59 = vld [vmem:[%s838_s1] sm:$0xff]  ;;  %v198_v60 = vld [vmem:[%s838_s1 + $0x58] sm:$0xff]  ;;  %v197_v62 = vld [vmem:[%s838_s1 + $0x50] sm:$0xff] }
  0x28   : > { %270 = vmatpush1.msra.mxu0 %v211_v35  ;;  %339 = vmatpush1.msra.mxu1 %v217_v42  ;;  %v186_v61 = vld [vmem:[#allocation2] sm:$0xff]  ;;  %v194_v63 = vld [vmem:[%s838_s1 + $0x38] sm:$0xff]  ;;  %v193_v0 = vld [vmem:[%s838_s1 + $0x30] sm:$0xff] }
  0x29   : > { %271 = vmatprep.subr.mxu0 %v208_v37  ;;  %340 = vmatprep.subr.mxu1 %v214_v44  ;;  %v190_v1 = vld [vmem:[%s838_s1 + $0x18] sm:$0xff]  ;;  %v189_v2 = vld [vmem:[%s838_s1 + $0x10] sm:$0xff]  ;;  %v182_v3 = vld [vmem:[%s624_s18] sm:$0xff] }
  0x2a   : > { %272 = vmatpush1.msra.mxu0 %v207_v39  ;;  %341 = vmatpush1.msra.mxu1 %v213_v46  ;;  %v183_v5 = vld [vmem:[%s624_s18 + $0x8] sm:$0xff]  ;;  %v185_v12 = vld [vmem:[%s624_s18 + $0x18] sm:$0xff]  ;;  %v184_v14 = vld [vmem:[%s624_s18 + $0x10] sm:$0xff] }
  0x2b   : > { %273 = vmatprep.subr.mxu0 %v204_v41  ;;  %342 = vmatprep.subr.mxu1 %v210_v48  ;;  %v416_v25 = vld [vmem:[#allocation3] sm:$0xff] }
  0x2c   : > { %274 = vmatpush1.msra.mxu0 %v203_v43  ;;  %343 = vmatpush1.msra.mxu1 %v209_v50 }
  0x2d   : > { %275 = vmatprep.subr.mxu0 %v200_v45  ;;  %344 = vmatprep.subr.mxu1 %v206_v52 }
  0x2e   : > { %276 = vmatpush1.msra.mxu0 %v199_v47  ;;  %345 = vmatpush1.msra.mxu1 %v205_v54 }
  0x2f   : > { %277 = vmatprep.subr.mxu0 %v196_v49  ;;  %346 = vmatprep.subr.mxu1 %v202_v56 }
  0x30   : > { %278 = vmatpush1.msra.mxu0 %v195_v51  ;;  %347 = vmatpush1.msra.mxu1 %v201_v58 }
  0x31   : > { %279 = vmatprep.subr.mxu0 %v192_v53  ;;  %348 = vmatprep.subr.mxu1 %v198_v60 }
  0x32   : > { %280 = vmatpush1.msra.mxu0 %v191_v55  ;;  %349 = vmatpush1.msra.mxu1 %v197_v62 }
  0x33   : > { %281 = vmatprep.subr.mxu0 %v188_v57  ;;  %350 = vmatprep.subr.mxu1 %v194_v63 }
  0x34   : > { %282 = vmatpush1.msra.mxu0 %v187_v59  ;;  %351 = vmatpush1.msra.mxu1 %v193_v0 }
  0x35   : > { %316 = vmatmul.mubr.f32.vlgmr.msra.gmra.mxu0 %v186_v61  ;;  %352 = vmatprep.subr.mxu1 %v190_v1 }
  0x36   : > { %353 = vmatpush1.msra.mxu1 %v189_v2 }
  0x37   : > { %387 = vmatmul.mubr.f32.vlgmr.msra.gmra.mxu1 %v186_v61 }
  0xf5   : > { %v317_v4 = vpop.f32.mrf.mxu0 }
  0xf6   : > { %v393_v6 = vadd.f32 %v317_v4, %v182_v3 }
  0xf7   : > { %v319_v7 = vpop.f32.mrf.mxu0  ;;  %v388_v11 = vpop.f32.mrf.mxu1 }
  0xf8   : > { %v514_v8 = vmul.f32 -1.442695, %v393_v6  ;;  %v394_v9 = vadd.f32 %v319_v7, %v183_v5  ;;  %v395_v16 = vadd.f32 %v388_v11, %v184_v14 }
  0xf9   : > { %v390_v13 = vpop.f32.mrf.mxu1 }
  0xfa   : > { %546 = vpow2.f32 %v514_v8  ;;  %v515_v10 = vmul.f32 -1.442695, %v394_v9  ;;  %v396_v15 = vadd.f32 %v390_v13, %v185_v12 }
  0xfc   : > { %548 = vpow2.f32 %v515_v10  ;;  %v516_v17 = vmul.f32 -1.442695, %v396_v15 }
  0xfd   : > { %550 = vtanh.f32 %v395_v16 }
  0xfe   : > { %552 = vpow2.f32 %v516_v17 }
 0x107   : > { %v547_v18 = vpop.eup %546 }
 0x108   : > { %v400_v19 = vadd.f32 1.0, %v547_v18 }
 0x109   : > { %v549_v20 = vpop.eup %548 }
 0x10a   : > { %554 = vrcp.f32 %v400_v19  ;;  %v406_v21 = vadd.f32 1.0, %v549_v20  ;;  %v551_v22 = vpop.eup %550 }
 0x10b   : > { %v553_v23 = vpop.eup %552 }
 0x10c   : > { %556 = vrcp.f32 %v406_v21  ;;  %v413_v27 = vadd.f32 1.0, %v553_v23 }
 0x10e   : > { %558 = vrcp.f32 %v413_v27 }
 0x117   : > { %v555_v24 = vpop.eup %554 }
 0x118   : > { %v418_v29 = vmul.f32 %v555_v24, %v551_v22 }
 0x119   : > { %v557_v26 = vpop.eup %556 }
 0x11a   : > { %v417_v28 = vmul.f32 %v557_v26, %v416_v25 }
 0x11b   : > { %v559_v31 = vpop.eup %558 }
 0x11c   : > { %v419_v30 = vadd.f32 %v418_v29, %v417_v28 }
 0x11e   : > { %560 = vtanh.f32 %v419_v30  ;;  %422 = vst [vmem:[#allocation3] sm:$0xff] %v419_v30 }
 0x12b   : > { %v561_v32 = vpop.eup %560 }
 0x12c   : > { %v421_v33 = vmul.f32 %v561_v32, %v559_v31 }
 0x12e   : > { %423 = vst [vmem:[#allocation2] sm:$0xff] %v421_v33  ;;  %424 = vst [vmem:[%s629_s21] sm:$0xff] %v421_v33 }
 0x12f PF: > { %s12_s11 = sadd.s32 1, %s584_s11   ;;  %s840_s9 = smov %s580_s10 }
 0x130   : > { %p9_p6 = scmp.ge.s32.totalorder %s12_s11, 11   ;;  %s841_s10 = smov %s843_s12 }
 0x132   :  { %11 = sbr.rel (!%p9_p6) target bundleno = 2 (0x2), region = 62 }

</bundles_post_ra>
